<compile_context>
chip_gen: v5e
topology: v5e:2x2
jax: 0.10.0
libtpu: 0.0.40
codegen_flags: <defaults>
</compile_context>

<pallas_src>
import functools
from math import log

import jax
import jax.numpy as jnp
from jax import lax
from jax.experimental import pallas as pl
from jax.experimental.pallas import tpu as pltpu


# --------------------------------------------------------------------------- #
# Kernel
# --------------------------------------------------------------------------- #
def _proto_loss_kernel(temps_ref, s_ref, t_ref, pn_ref,        # inputs
                       ce_ref, colp_ref,                        # outputs (per-ti partials)
                       targets_ref,                             # scratch: cached teacher targets
                       *, mxu_dtype, tile_b, b_t_valid, needs_mask):
    """One grid step: one (TILE_B, D) student tile of augment `ai` against
    teacher tile `ti` and the resident pre-normalized (D, P) prototypes."""
    ti = pl.program_id(0)            # teacher-tile index (outer, "parallel")
    ai = pl.program_id(1)            # augment index      (inner, "arbitrary")

    inv_s_temp = temps_ref[0]        # 1 / student_temp
    inv_t_temp = temps_ref[1]        # 1 / teacher_temp
    eps2 = jnp.float32(1e-24)        # eps^2 for the F.normalize clamp (eps = 1e-12)

    pn = pn_ref[...]                 # (D, P), pre-normalized, MXU operand dtype

    def row_inv_norm(x32):
        # 1 / max(||row||, eps) == rsqrt(max(sum(x^2), eps^2))  (EUP rsqrt)
        ssq = jnp.sum(x32 * x32, axis=1, keepdims=True)
        return lax.rsqrt(jnp.maximum(ssq, eps2))

    # ---- teacher path: runs once per teacher tile, result cached in VMEM ----
    @pl.when(ai == 0)
    def _teacher():
        t32 = t_ref[...].astype(jnp.float32)
        logits_t = jnp.dot(t_ref[...].astype(mxu_dtype), pn,
                           preferred_element_type=jnp.float32)
        # fold L2 normalization + temperature into one (TILE_B, 1) scale,
        # applied in f32 to the (TILE_B, P) logits.
        logits_t = logits_t * (row_inv_norm(t32) * inv_t_temp)
        m_t = jnp.max(logits_t, axis=1, keepdims=True)
        u_t = jnp.exp(logits_t - m_t)
        den_t = jnp.sum(u_t, axis=1, keepdims=True)
        targets_ref[...] = u_t * (1.0 / den_t)          # exact reciprocal (teacher)

    # ---- student path: every grid step ----
    s32 = s_ref[...].astype(jnp.float32)
    logits_s = jnp.dot(s_ref[...].astype(mxu_dtype), pn,
                       preferred_element_type=jnp.float32)
    logits_s = logits_s * (row_inv_norm(s32) * inv_s_temp)

    m_s = jnp.max(logits_s, axis=1, keepdims=True)
    z = logits_s - m_s                                   # reused for exp and log-softmax
    u_s = jnp.exp(z)
    den_s = jnp.sum(u_s, axis=1, keepdims=True)
    log_probs = z - jnp.log(den_s)                       # log-softmax (no log(0))
    probs = u_s * pl.reciprocal(den_s, approx=True)      # softmax for avg_probs

    tlp = targets_ref[...] * log_probs                   # targets * log(probs)  (sign in wrapper)

    if needs_mask:
        # rows past the real teacher batch (padding) contribute nothing.
        row = ti * tile_b + lax.broadcasted_iota(jnp.int32, (tile_b, 1), 0)
        valid = row < b_t_valid
        probs = jnp.where(valid, probs, 0.0)
        tlp = jnp.where(valid, tlp, 0.0)

    # Fold rows to 8 sublanes with VPU adds (no per-step XLU sublane reduce).
    probs8 = jnp.sum(probs.reshape(tile_b // 8, 8, -1), axis=0)
    tlp8 = jnp.sum(tlp.reshape(tile_b // 8, 8, -1), axis=0)

    # Accumulate into the resident output block (same block across the augment
    # axis; distinct blocks across teacher tiles -> outer axis is parallel).
    @pl.when(ai == 0)
    def _init_out():
        ce_ref[...] = tlp8
        colp_ref[...] = probs8

    @pl.when(ai > 0)
    def _acc_out():
        ce_ref[...] += tlp8
        colp_ref[...] += probs8


# --------------------------------------------------------------------------- #
# Wrapper-side tiling / budgeting helpers
# --------------------------------------------------------------------------- #
def _vmem_budget_bytes():
    """Generation-aware VMEM budget (leave ~1/8 headroom for Mosaic internals)."""
    try:
        info = pltpu.get_tpu_info()
        cap = int(getattr(info, "vmem_capacity_bytes", 0) or 0)
        if cap > 0:
            return min((cap * 7) // 8, 112 * 1024 * 1024)
    except Exception:
        pass
    return 48 * 1024 * 1024          # conservative fallback, fits every generation


def _vmem_estimate(tile_b, d, p, in_itemsize, mxu_itemsize):
    return int(
        2 * 2 * tile_b * d * in_itemsize     # student + teacher tiles, double buffered
        + 2 * d * p * mxu_itemsize           # resident (D, P) normalized prototypes
        + tile_b * p * 4                     # cached teacher targets (scratch)
        + 2 * 2 * 8 * p * 4                  # partial outputs (2 outs x 2 buffers)
        + 8 * tile_b * p * 4                 # f32 logits / exp / probs / log-probs temporaries
        + 2 * tile_b * d * 4                 # f32 working copies of the streamed tiles
    )


def _choose_tile_b(b_t, d, p, in_itemsize, mxu_itemsize, budget, cap):
    """Largest multiple-of-8 divisor of the padded teacher batch that fits VMEM."""
    b_t_pad = max(8, ((b_t + 7) // 8) * 8)
    cands = [t for t in range(min(cap, b_t_pad), 0, -8) if b_t_pad % t == 0]
    for t in cands:
        if _vmem_estimate(t, d, p, in_itemsize, mxu_itemsize) * 5 // 4 <= budget:
            return t, b_t_pad
    raise ValueError(
        f"ProtoLoss Pallas kernel: no row tile fits the {budget >> 20} MiB VMEM "
        f"budget (D={d}, P={p}).")


# --------------------------------------------------------------------------- #
# Public entry point
# --------------------------------------------------------------------------- #
def proto_loss_pallas(inv_temps, student, teacher, prototypes, *,
                      mxu_dtype=jnp.bfloat16, tile_cap=512):
    b_s, d = student.shape
    b_t, d_t = teacher.shape
    p, d_p = prototypes.shape
    assert d == d_t == d_p, "feature dims must agree"
    assert b_s % b_t == 0, "student batch must be an integer multiple of teacher batch"
    nb_augment = b_s // b_t

    mxu_dtype = jnp.dtype(mxu_dtype)
    in_itemsize = max(student.dtype.itemsize, teacher.dtype.itemsize)
    budget = _vmem_budget_bytes()
    cap = max(8, (int(tile_cap) // 8) * 8)
    tile_b, b_t_pad = _choose_tile_b(b_t, d, p, in_itemsize, mxu_dtype.itemsize,
                                     budget, cap)
    t_tiles = b_t_pad // tile_b
    needs_mask = (b_t_pad != b_t)

    # Prototypes: L2-normalize, cast to MXU dtype, transpose to (D, P) once in
    # the wrapper -> small resident block, standard MXU contraction, no step-0
    # bubble inside the kernel.
    p32 = prototypes.astype(jnp.float32)
    pnorm = jnp.maximum(jnp.sqrt(jnp.sum(p32 * p32, axis=1, keepdims=True)), 1e-12)
    pn_t = (p32 / pnorm).astype(mxu_dtype).T              # (D, P)

    if needs_mask:
        # Pad each augment block of the student and the teacher to b_t_pad rows;
        # the padded rows are masked out inside the kernel.
        pad = b_t_pad - b_t
        teacher = jnp.pad(teacher, ((0, pad), (0, 0)))
        student = jnp.pad(student.reshape(nb_augment, b_t, d),
                          ((0, 0), (0, pad), (0, 0))).reshape(nb_augment * b_t_pad, d)

    kernel = functools.partial(_proto_loss_kernel, mxu_dtype=mxu_dtype,
                               tile_b=tile_b, b_t_valid=b_t, needs_mask=needs_mask)

    ce_part, colp_part = pl.pallas_call(
        kernel,
        out_shape=(jax.ShapeDtypeStruct((t_tiles * 8, p), jnp.float32),
                   jax.ShapeDtypeStruct((t_tiles * 8, p), jnp.float32)),
        grid=(t_tiles, nb_augment),
        in_specs=[
            pl.BlockSpec(memory_space=pltpu.MemorySpace.SMEM),                 # [1/ts, 1/tt]
            pl.BlockSpec((tile_b, d), lambda ti, ai: (ai * t_tiles + ti, 0)),  # student tile
            pl.BlockSpec((tile_b, d), lambda ti, ai: (ti, 0)),                 # teacher tile (const over ai)
            pl.BlockSpec((d, p), lambda ti, ai: (0, 0)),                       # prototypes (D, P), resident
        ],
        out_specs=(
            pl.BlockSpec((8, p), lambda ti, ai: (ti, 0)),   # sum(targets*log_probs) per ti
            pl.BlockSpec((8, p), lambda ti, ai: (ti, 0)),   # per-prototype prob mass per ti
        ),
        scratch_shapes=[
            pltpu.VMEM((tile_b, p), jnp.float32),           # cached teacher softmax targets
        ],
        compiler_params=pltpu.CompilerParams(
            # Outer teacher-tile axis emits disjoint partial outputs -> parallel
            # (megacore-shardable on v7x).  Inner augment axis carries the cached
            # targets + resident output block -> arbitrary (sequential).
            dimension_semantics=("parallel", "arbitrary"),
            vmem_limit_bytes=int(budget),
        ),
    )(inv_temps, student, teacher, pn_t)

    # Tiny final reduction (t_tiles x 8 x P f32) done by XLA in the wrapper.
    inv_rows = jnp.float32(1.0 / b_s)
    loss = -jnp.sum(ce_part) * inv_rows
    avg_probs = jnp.sum(colp_part, axis=0) * inv_rows
    rloss = (jnp.sum(avg_probs * jnp.log(jnp.maximum(avg_probs, 1e-30)))
             + jnp.float32(log(float(p))))
    return loss, rloss


class ProtoLossPallas:
    """JAX/Pallas port of pipeline/loss/proto.py::ProtoLoss (forward only)."""

    def __init__(self, nproto, warmup_teacher_temp, teacher_temp,
                 warmup_teacher_temp_epochs, nepochs, student_temp=0.1):
        self.nproto = nproto
        self.student_temp = float(student_temp)
        warm = jnp.linspace(warmup_teacher_temp, teacher_temp,
                            warmup_teacher_temp_epochs)
        rest = jnp.ones(nepochs - warmup_teacher_temp_epochs) * teacher_temp
        self.teacher_temp_schedule = jnp.concatenate([warm, rest]).astype(jnp.float32)
        # proto_labels (identity for smoothing=0) is folded into the kernel.

    def __call__(self, student_output, teacher_output, prototypes, epoch, *,
                 mxu_dtype=jnp.bfloat16, tile_cap=512):
        teacher_temp = self.teacher_temp_schedule[int(epoch)]
        inv_temps = jnp.stack([jnp.float32(1.0 / self.student_temp),
                               jnp.float32(1.0) / teacher_temp]).astype(jnp.float32)
        return proto_loss_pallas(inv_temps, student_output, teacher_output,
                                 prototypes, mxu_dtype=mxu_dtype, tile_cap=tile_cap)


# --------------------------------------------------------------------------- #
# Pure-JAX reference (f32) of the PyTorch forward, for a sanity check.
# --------------------------------------------------------------------------- #
def _reference(student, teacher, prototypes, student_temp, teacher_temp):
    def l2n(x):
        return x / jnp.maximum(jnp.linalg.norm(x, axis=1, keepdims=True), 1e-12)

    def snn(q, s, temp):
        return jax.nn.softmax(l2n(q) @ l2n(s).T / temp, axis=1)

    probs = snn(student, prototypes, student_temp)
    targets = snn(teacher, prototypes, teacher_temp)
    nb_aug = student.shape[0] // teacher.shape[0]
    targets = jnp.concatenate([targets] * nb_aug, axis=0)
    loss = jnp.mean(jnp.sum(-targets * jnp.log(probs), axis=1))
    avg_probs = jnp.mean(probs, axis=0)
    rloss = jnp.sum(avg_probs * jnp.log(avg_probs)) + log(float(avg_probs.shape[0]))
    return loss, rloss


if __name__ == "__main__":
    # Small, lane-aligned demo shapes: 16 teacher rows x 2 augments, D=128, P=128.
    B_t, nb_augment, D, P = 16, 2, 128, 128
    B_s = B_t * nb_augment

    key = jax.random.PRNGKey(0)
    k1, k2, k3, k4, k5 = jax.random.split(key, 5)
    student = jax.random.normal(k1, (B_s, D), dtype=jnp.float32)
    teacher = jax.random.normal(k2, (B_t, D), dtype=jnp.float32)
    prototypes = jax.random.normal(k3, (P, D), dtype=jnp.float32)

    loss_mod = ProtoLossPallas(
        nproto=P, warmup_teacher_temp=0.04, teacher_temp=0.07,
        warmup_teacher_temp_epochs=5, nepochs=10, student_temp=0.1)
    epoch = 3
    t_temp = float(loss_mod.teacher_temp_schedule[epoch])

    # 1) f32-MXU path with tile_cap=8 -> 2x2 grid: exercises the parallel
    #    teacher-tile axis, cached-targets reuse across augments and the
    #    per-tile partial outputs.
    loss32, rloss32 = loss_mod(student, teacher, prototypes, epoch,
                               mxu_dtype=jnp.float32, tile_cap=8)
    # 2) default bf16-MXU path (single teacher tile).
    lossbf, rlossbf = loss_mod(student, teacher, prototypes, epoch)
    # 3) teacher batch not a multiple of 8 -> wrapper-side pad + in-kernel mask.
    B_t2 = 12
    student2 = jax.random.normal(k4, (B_t2 * nb_augment, D), dtype=jnp.float32)
    teacher2 = jax.random.normal(k5, (B_t2, D), dtype=jnp.float32)
    lossm, rlossm = loss_mod(student2, teacher2, prototypes, epoch,
                             mxu_dtype=jnp.float32)

    jax.block_until_ready((loss32, rloss32, lossbf, rlossbf, lossm, rlossm))

    ref_loss, ref_rloss = _reference(student, teacher, prototypes, 0.1, t_temp)
    ref_loss2, ref_rloss2 = _reference(student2, teacher2, prototypes, 0.1, t_temp)

    # f32-MXU paths: tight check (difference is only the approx student reciprocal).
    assert jnp.allclose(loss32, ref_loss, rtol=1e-2, atol=1e-2), (loss32, ref_loss)
    assert jnp.allclose(rloss32, ref_rloss, rtol=1e-2, atol=1e-2), (rloss32, ref_rloss)
    assert jnp.allclose(lossm, ref_loss2, rtol=1e-2, atol=1e-2), (lossm, ref_loss2)
    assert jnp.allclose(rlossm, ref_rloss2, rtol=1e-2, atol=1e-2), (rlossm, ref_rloss2)
    # bf16-MXU path (default; feeds the v6e/v7x 256x256 MXU): looser tolerance.
    assert jnp.allclose(lossbf, ref_loss, rtol=4e-2, atol=4e-2), (lossbf, ref_loss)
    assert jnp.allclose(rlossbf, ref_rloss, rtol=4e-2, atol=4e-2), (rlossbf, ref_rloss)

    print("KERNEL_OK")
</pallas_src>

<mosaic_0001>
module attributes {stable_mosaic.version = 11 : i64} {
  func.func @_proto_loss_kernel(%arg0: i32, %arg1: i32, %arg2: memref<2xf32, #tpu.memory_space<smem>>, %arg3: memref<8x128xf32, #tpu.memory_space<vmem>>, %arg4: memref<8x128xf32, #tpu.memory_space<vmem>>, %arg5: memref<128x128xf32, #tpu.memory_space<vmem>>, %arg6: memref<8x128xf32, #tpu.memory_space<vmem>>, %arg7: memref<8x128xf32, #tpu.memory_space<vmem>>, %arg8: memref<8x128xf32, #tpu.memory_space<vmem>>) attributes {dimension_semantics = [#tpu.dimension_semantics<parallel>, #tpu.dimension_semantics<arbitrary>], iteration_bounds = array<i64: 2, 2>, scalar_prefetch = 0 : i64, scratch_operands = 1 : i64, tpu.core_type = #tpu.core_type<tc>, window_params = [{transform_indices = @transform_0, window_bounds = array<i64: 2>}, {transform_indices = @transform_1, window_bounds = array<i64: 8, 128>}, {transform_indices = @transform_2, window_bounds = array<i64: 8, 128>}, {pipeline_mode = #tpu.pipeline_mode<synchronous>, transform_indices = @transform_3, window_bounds = array<i64: 128, 128>}, {transform_indices = @transform_4, window_bounds = array<i64: 8, 128>}, {transform_indices = @transform_5, window_bounds = array<i64: 8, 128>}]} {
    %c0 = arith.constant 0 : index
    %0 = memref.load %arg2[%c0] : memref<2xf32, #tpu.memory_space<smem>>
    %c1 = arith.constant 1 : index
    %1 = memref.load %arg2[%c1] : memref<2xf32, #tpu.memory_space<smem>>
    %c0_0 = arith.constant 0 : index
    %c0_1 = arith.constant 0 : index
    %2 = vector.load %arg5[%c0_0, %c0_1] : memref<128x128xf32, #tpu.memory_space<vmem>>, vector<128x128xf32>
    %c0_i32 = arith.constant 0 : i32
    %3 = arith.cmpi eq, %arg1, %c0_i32 : i32
    %4 = arith.extui %3 : i1 to i32
    %cst = arith.constant 1.000000e-24 : f32
    %c0_i32_2 = arith.constant 0 : i32
    %5 = arith.cmpi ne, %4, %c0_i32_2 : i32
    scf.if %5 {
      %c0_20 = arith.constant 0 : index
      %c0_21 = arith.constant 0 : index
      %44 = vector.load %arg4[%c0_20, %c0_21] : memref<8x128xf32, #tpu.memory_space<vmem>>, vector<8x128xf32>
      %c0_22 = arith.constant 0 : index
      %c0_23 = arith.constant 0 : index
      %45 = vector.load %arg4[%c0_22, %c0_23] : memref<8x128xf32, #tpu.memory_space<vmem>>, vector<8x128xf32>
      %cst_24 = arith.constant dense<0.000000e+00> : vector<8x128xf32>
      %46 = tpu.matmul %45, %2, %cst_24 {dimension_numbers = #tpu.dot_dimension_numbers<[1], [0], [0], [1], [0, 0, 1, 1], [], []>} : vector<8x128xf32>, vector<128x128xf32>, vector<8x128xf32> -> vector<8x128xf32>
      %47 = arith.mulf %44, %44 : vector<8x128xf32>
      %cst_25 = arith.constant dense<0.000000e+00> : vector<8xf32>
      %48 = vector.multi_reduction <add>, %47, %cst_25 [1] : vector<8x128xf32> to vector<8xf32>
      %49 = vector.shape_cast %48 : vector<8xf32> to vector<8x1xf32>
      %50 = vector.broadcast %cst : f32 to vector<8x1xf32>
      %51 = arith.maximumf %49, %50 : vector<8x1xf32>
      %52 = math.rsqrt %51 : vector<8x1xf32>
      %53 = vector.broadcast %1 : f32 to vector<8x1xf32>
      %54 = arith.mulf %52, %53 : vector<8x1xf32>
      %55 = vector.broadcast %54 : vector<8x1xf32> to vector<8x128xf32>
      %56 = arith.mulf %46, %55 : vector<8x128xf32>
      %cst_26 = arith.constant dense<0xFF800000> : vector<8xf32>
      %57 = vector.multi_reduction <maximumf>, %56, %cst_26 [1] : vector<8x128xf32> to vector<8xf32>
      %58 = vector.shape_cast %57 : vector<8xf32> to vector<8x1xf32>
      %59 = vector.broadcast %58 : vector<8x1xf32> to vector<8x128xf32>
      %60 = arith.subf %56, %59 : vector<8x128xf32>
      %61 = math.exp %60 : vector<8x128xf32>
      %cst_27 = arith.constant dense<0.000000e+00> : vector<8xf32>
      %62 = vector.multi_reduction <add>, %61, %cst_27 [1] : vector<8x128xf32> to vector<8xf32>
      %63 = vector.shape_cast %62 : vector<8xf32> to vector<8x1xf32>
      %cst_28 = arith.constant 1.000000e+00 : f32
      %64 = vector.broadcast %cst_28 : f32 to vector<8x1xf32>
      %65 = arith.divf %64, %63 : vector<8x1xf32>
      %66 = vector.broadcast %65 : vector<8x1xf32> to vector<8x128xf32>
      %67 = arith.mulf %61, %66 : vector<8x128xf32>
      %c0_29 = arith.constant 0 : index
      %c0_30 = arith.constant 0 : index
      %68 = vector.load %arg8[%c0_29, %c0_30] : memref<8x128xf32, #tpu.memory_space<vmem>>, vector<8x128xf32>
      tpu.vector_store %arg8[%c0_29, %c0_30], %67 {strides = array<i32>} : memref<8x128xf32, #tpu.memory_space<vmem>>, vector<8x128xf32>,
    } else {
    }
    %c0_3 = arith.constant 0 : index
    %c0_4 = arith.constant 0 : index
    %6 = vector.load %arg3[%c0_3, %c0_4] : memref<8x128xf32, #tpu.memory_space<vmem>>, vector<8x128xf32>
    %c0_5 = arith.constant 0 : index
    %c0_6 = arith.constant 0 : index
    %7 = vector.load %arg3[%c0_5, %c0_6] : memref<8x128xf32, #tpu.memory_space<vmem>>, vector<8x128xf32>
    %cst_7 = arith.constant dense<0.000000e+00> : vector<8x128xf32>
    %8 = tpu.matmul %7, %2, %cst_7 {dimension_numbers = #tpu.dot_dimension_numbers<[1], [0], [0], [1], [0, 0, 1, 1], [], []>} : vector<8x128xf32>, vector<128x128xf32>, vector<8x128xf32> -> vector<8x128xf32>
    %9 = arith.mulf %6, %6 : vector<8x128xf32>
    %cst_8 = arith.constant dense<0.000000e+00> : vector<8xf32>
    %10 = vector.multi_reduction <add>, %9, %cst_8 [1] : vector<8x128xf32> to vector<8xf32>
    %11 = vector.shape_cast %10 : vector<8xf32> to vector<8x1xf32>
    %cst_9 = arith.constant 1.000000e-24 : f32
    %12 = vector.broadcast %cst_9 : f32 to vector<8x1xf32>
    %13 = arith.maximumf %11, %12 : vector<8x1xf32>
    %14 = math.rsqrt %13 : vector<8x1xf32>
    %15 = vector.broadcast %0 : f32 to vector<8x1xf32>
    %16 = arith.mulf %14, %15 : vector<8x1xf32>
    %17 = vector.broadcast %16 : vector<8x1xf32> to vector<8x128xf32>
    %18 = arith.mulf %8, %17 : vector<8x128xf32>
    %cst_10 = arith.constant dense<0xFF800000> : vector<8xf32>
    %19 = vector.multi_reduction <maximumf>, %18, %cst_10 [1] : vector<8x128xf32> to vector<8xf32>
    %20 = vector.shape_cast %19 : vector<8xf32> to vector<8x1xf32>
    %21 = vector.broadcast %20 : vector<8x1xf32> to vector<8x128xf32>
    %22 = arith.subf %18, %21 : vector<8x128xf32>
    %23 = math.exp %22 : vector<8x128xf32>
    %cst_11 = arith.constant dense<0.000000e+00> : vector<8xf32>
    %24 = vector.multi_reduction <add>, %23, %cst_11 [1] : vector<8x128xf32> to vector<8xf32>
    %25 = vector.shape_cast %24 : vector<8xf32> to vector<8x1xf32>
    %26 = math.log %25 : vector<8x1xf32>
    %27 = vector.broadcast %26 : vector<8x1xf32> to vector<8x128xf32>
    %28 = arith.subf %22, %27 : vector<8x128xf32>
    %29 = tpu.reciprocal %25 {approx = true} : vector<8x1xf32> -> vector<8x1xf32>
    %30 = vector.broadcast %29 : vector<8x1xf32> to vector<8x128xf32>
    %31 = arith.mulf %23, %30 : vector<8x128xf32>
    %c0_12 = arith.constant 0 : index
    %c0_13 = arith.constant 0 : index
    %32 = vector.load %arg8[%c0_12, %c0_13] : memref<8x128xf32, #tpu.memory_space<vmem>>, vector<8x128xf32>
    %33 = arith.mulf %32, %28 : vector<8x128xf32>
    %34 = vector.shape_cast %31 : vector<8x128xf32> to vector<1x8x128xf32>
    %cst_14 = arith.constant dense<0.000000e+00> : vector<8x128xf32>
    %35 = vector.multi_reduction <add>, %34, %cst_14 [0] : vector<1x8x128xf32> to vector<8x128xf32>
    %36 = vector.shape_cast %33 : vector<8x128xf32> to vector<1x8x128xf32>
    %cst_15 = arith.constant dense<0.000000e+00> : vector<8x128xf32>
    %37 = vector.multi_reduction <add>, %36, %cst_15 [0] : vector<1x8x128xf32> to vector<8x128xf32>
    %c0_i32_16 = arith.constant 0 : i32
    %38 = arith.cmpi eq, %arg1, %c0_i32_16 : i32
    %39 = arith.extui %38 : i1 to i32
    %c0_i32_17 = arith.constant 0 : i32
    %40 = arith.cmpi ne, %39, %c0_i32_17 : i32
    scf.if %40 {
      %c0_20 = arith.constant 0 : index
      %c0_21 = arith.constant 0 : index
      %44 = vector.load %arg6[%c0_20, %c0_21] : memref<8x128xf32, #tpu.memory_space<vmem>>, vector<8x128xf32>
      tpu.vector_store %arg6[%c0_20, %c0_21], %37 {strides = array<i32>} : memref<8x128xf32, #tpu.memory_space<vmem>>, vector<8x128xf32>,
      %c0_22 = arith.constant 0 : index
      %c0_23 = arith.constant 0 : index
      %45 = vector.load %arg7[%c0_22, %c0_23] : memref<8x128xf32, #tpu.memory_space<vmem>>, vector<8x128xf32>
      tpu.vector_store %arg7[%c0_22, %c0_23], %35 {strides = array<i32>} : memref<8x128xf32, #tpu.memory_space<vmem>>, vector<8x128xf32>,
    } else {
    }
    %c0_i32_18 = arith.constant 0 : i32
    %41 = arith.cmpi sgt, %arg1, %c0_i32_18 : i32
    %42 = arith.extui %41 : i1 to i32
    %c0_i32_19 = arith.constant 0 : i32
    %43 = arith.cmpi ne, %42, %c0_i32_19 : i32
    scf.if %43 {
      %c0_20 = arith.constant 0 : index
      %c0_21 = arith.constant 0 : index
      %44 = vector.load %arg6[%c0_20, %c0_21] : memref<8x128xf32, #tpu.memory_space<vmem>>, vector<8x128xf32>
      %45 = arith.addf %44, %37 : vector<8x128xf32>
      %c0_22 = arith.constant 0 : index
      %c0_23 = arith.constant 0 : index
      %46 = vector.load %arg6[%c0_22, %c0_23] : memref<8x128xf32, #tpu.memory_space<vmem>>, vector<8x128xf32>
      tpu.vector_store %arg6[%c0_22, %c0_23], %45 {strides = array<i32>} : memref<8x128xf32, #tpu.memory_space<vmem>>, vector<8x128xf32>,
      %c0_24 = arith.constant 0 : index
      %c0_25 = arith.constant 0 : index
      %47 = vector.load %arg7[%c0_24, %c0_25] : memref<8x128xf32, #tpu.memory_space<vmem>>, vector<8x128xf32>
      %48 = arith.addf %47, %35 : vector<8x128xf32>
      %c0_26 = arith.constant 0 : index
      %c0_27 = arith.constant 0 : index
      %49 = vector.load %arg7[%c0_26, %c0_27] : memref<8x128xf32, #tpu.memory_space<vmem>>, vector<8x128xf32>
      tpu.vector_store %arg7[%c0_26, %c0_27], %48 {strides = array<i32>} : memref<8x128xf32, #tpu.memory_space<vmem>>, vector<8x128xf32>,
    } else {
    }
    return
  }
  func.func @transform_0(%arg0: i32, %arg1: i32) -> i32 {
    %c0_i32 = arith.constant 0 : i32
    %c0_i32_0 = arith.constant 0 : i32
    return %c0_i32 : i32
  }
  func.func @transform_1(%arg0: i32, %arg1: i32) -> (i32, i32) {
    %c2_i32 = arith.constant 2 : i32
    %0 = arith.muli %arg1, %c2_i32 : i32
    %1 = arith.addi %0, %arg0 : i32
    %c0_i32 = arith.constant 0 : i32
    %c0_i32_0 = arith.constant 0 : i32
    return %1, %c0_i32 : i32, i32
  }
  func.func @transform_2(%arg0: i32, %arg1: i32) -> (i32, i32) {
    %c0_i32 = arith.constant 0 : i32
    %c0_i32_0 = arith.constant 0 : i32
    return %arg0, %c0_i32 : i32, i32
  }
  func.func @transform_3(%arg0: i32, %arg1: i32) -> (i32, i32) {
    %c0_i32 = arith.constant 0 : i32
    %c0_i32_0 = arith.constant 0 : i32
    %c0_i32_1 = arith.constant 0 : i32
    return %c0_i32, %c0_i32_0 : i32, i32
  }
  func.func @transform_4(%arg0: i32, %arg1: i32) -> (i32, i32) {
    %c0_i32 = arith.constant 0 : i32
    %c0_i32_0 = arith.constant 0 : i32
    return %arg0, %c0_i32 : i32, i32
  }
  func.func @transform_5(%arg0: i32, %arg1: i32) -> (i32, i32) {
    %c0_i32 = arith.constant 0 : i32
    %c0_i32_0 = arith.constant 0 : i32
    return %arg0, %c0_i32 : i32, i32
  }
}

</mosaic_0001>

<bundles_post_ra>
// kernel: tpu_custom_call.1
= control target key start
LH: loop header
LB: loop body
LE: loop exit
PB: predicated region body
PF: predicated region fallthrough
CT: control target
= control target key end

     0   :  { %s1528_s0 = inlined_call_operand.hbm [shape: f32[2], index: 0, kind: input, shape index: {}]   ;;  %s1529_s1 = inlined_call_operand.hbm [shape: f32[32,128], index: 1, kind: input, shape index: {}]   ;;  %s1530_s2 = inlined_call_operand.hbm [shape: f32[16,128], index: 2, kind: input, shape index: {}]   ;;  %s1531_s3 = inlined_call_operand.hbm [shape: f32[128,128], index: 3, kind: input, shape index: {}]   ;;  %s1532_s4 = inlined_call_operand.hbm [shape: f32[16,128], index: 4, kind: output, shape index: {0}]   ;;  %s1533_s5 = inlined_call_operand.hbm [shape: f32[16,128], index: 5, kind: output, shape index: {1}]  }
   0x1   :  { %1537 = sst [smem:[#allocation24_spill]] %s1528_s0 }
   0x2   :  { %1538 = sst [smem:[#allocation25_spill]] %s1529_s1 }
   0x3   :  { %1539 = sst [smem:[#allocation26_spill]] %s1531_s3 }
   0x4   :  { %11 = vsyncpa [#allocation6], 0 }
   0x5   :  { %12 = vsyncpa [#allocation4], 0 }
   0x6   :  { %14 = vsyncpa [#allocation4 + $0x1], 0 }
   0x7   :  { %15 = vsyncpa [#allocation9], 0 }
   0x8   :  { %17 = vsyncpa [#allocation9 + $0x1], 0 }
   0x9   :  { %18 = vsyncpa [#allocation5], 0 }
   0xa   :  { %20 = vsyncpa [#allocation5 + $0x1], 0 }
   0xb   :  { %21 = vsyncpa [#allocation13], 0 }
   0xc   :  { %23 = vsyncpa [#allocation13 + $0x1], 0  ;;  %s1176_s18 = smov 0   ;;  %s1178_s19 = smov 0  }
   0xd   :  { %s1180_s20 = smov 0   ;;  %s1182_s21 = smov 0  }
   0xe   :  { %s1184_s22 = smov 0   ;;  %s1186_s23 = smov 0  }
   0xf   :  { %s1188_s24 = smov 0   ;;  %s1190_s25 = smov 0  }
  0x10   :  { %s1192_s26 = smov 0   ;;  %s1194_s27 = smov 0  }
  0x11   :  { %s1196_s28 = smov 0  }
  0x12 LB: > { %1540 = sst [smem:[#allocation20_spill]] %s1132_s26  ;;  %s1235_s7 = sadd.s32 4294967295, %s1140_s28   ;;  %s1140_s28 = sphi %s1196_s28, %s29_s28   ;;  %s1136_s27 = sphi %s1194_s27, %s1566_s27   ;;  %s1132_s26 = sphi %s1192_s26, %s1557_s26   ;;  %s1128_s25 = sphi %s1190_s25, %s1565_s25   ;;  %s1124_s24 = sphi %s1188_s24, %s1556_s24   ;;  %s1120_s23 = sphi %s1186_s23, %s1564_s23   ;;  %s1116_s22 = sphi %s1184_s22, %s1563_s22   ;;  %s1112_s21 = sphi %s1182_s21, %s1562_s21   ;;  %s1108_s20 = sphi %s1180_s20, %s1561_s20   ;;  %s1104_s19 = sphi %s1178_s19, %s1560_s19   ;;  %s1100_s18 = sphi %s1176_s18, %s1559_s18  }
  0x13   : > { %s1541_s3 = sld [smem:[#allocation26_spill]]  ;;  %p694_p0 = scmp.ge.s32.totalorder %s1140_s28, 1 }
  0x14   : > { %p87_p1 = scmp.eq.s32.totalorder %s1235_s7, 0  ;;  %p196_p2 = scmp.lt.s32.totalorder %s1140_s28, 5 }
  0x15   : > { %s1142_s9 = smov [#allocation10]   ;;  %s1543_s0 = sld [smem:[#allocation24_spill]] }
  0x16   : > { %p1240_p3 = pnand %p694_p0, %p196_p2  ;;  %s219_s10 = sshll.u32 %s1142_s9, 4  ;;  %s220_s10 = int_to_ptr.vmem [resolvable:$true] %s219_s10 }
  0x17   : > { %s1143_s14 = smov 128   ;;  %s1144_s15 = smov 8  }
  0x18   : > { %p736_p4 = pneg %p1240_p3  ;;  %s1145_s16 = smov [#allocation3]  }
  0x19   : > { %s217_s6 = sshll.u32 %s1541_s3, 4  ;;  %s38_s17 = sadd.s32 1, %s1132_s26  ;;  %s218_s6 = int_to_ptr.hbm [resolvable:$true] %s217_s6 }
  0x1a   : > { %p737_p5 = pnand %p736_p4, %p87_p1  ;;  %s41_s29 = sadd.s32 1, %s1136_s27 }
  0x1b   : > { %s208_s13 = sshll.u32 %s1543_s0, 4  ;;  %p39_p6 = scmp.ge.s32.totalorder %s38_s17, 2  ;;  %s209_s13 = int_to_ptr.hbm [resolvable:$true] %s208_s13 }
  0x1c   : > { %742 = dma.hbm_to_vmem [thread:$0]  (!%p737_p5), %s218_s6, 2048, %s220_s10, [#allocation9], %s1143_s14, %s1143_s14, %s1144_s15  }
  0x1d   : > { %739 = dma.hbm_to_smem (!%p737_p5), %s209_s13, 16, %s1145_s16, [#allocation6]  }
  0x1e   : > { %s692_s30 = sshll.u32 %s1132_s26, 1  ;;  %s73_s11 = sadd.s32 1, %s1120_s23 }
  0x1f   : > { %s67_s9 = sadd.s32 %s1136_s27, %s692_s30  ;;  %s1568_s17 = smov (%p39_p6, %s38_s17), 0 }
  0x20   : > { %1544 = sst [smem:[#allocation21_spill]] %s1568_s17  ;;  %s1570_s29 = smov (!%p39_p6, %s41_s29), %s1136_s27 }
  0x21   : > { %s693_s6 = sshll.u32 %s1568_s17, 1  ;;  %p80_p7 = scmp.ne.s32.totalorder %s1120_s23, %s1116_s22 }
  0x22   : > { %p43_p8 = scmp.ge.s32.totalorder %s1570_s29, 2  ;;  %p81_p9 = scmp.eq.s32.totalorder %s1140_s28, 0 }
  0x23   : > { %p86_p10 = scmp.ne.s32.totalorder %s1116_s22, %s1112_s21  ;;  %p759_p11 = scmp.lt.s32.totalorder %s1140_s28, 4 }
  0x24   : > { %s1572_s29 = smov (%p43_p8, %s1570_s29), 0  ;;  %p1270_p12 = por %p81_p9, %p80_p7 }
  0x25   : > { %1545 = sst [smem:[#allocation22_spill]] %s1572_s29  ;;  %p1276_p13 = por %p87_p1, %p86_p10 }
  0x26   : > { %s69_s13 = sadd.s32 %s693_s6, %s1572_s29  ;;  %s96_s14 = ssub.s32 %s1136_s27, %s1572_s29 }
  0x27   : > { %s70_s21 = ssub.s32 %s67_s9, %s69_s13  ;;  %p1283_p0 = scmp.eq.s32.totalorder %s96_s14, 0 }
  0x28   : > { %p71_p2 = scmp.eq.s32.totalorder %s70_s21, 0  ;;  %s233_s16 = sand.u32 1, %s1120_s23  }
  0x29   : > { %s698_s30 = sshll.u32 %s233_s16, 3  ;;  %s700_s6 = sshll.u32 %s67_s9, 3 }
  0x2a   : > { %s1289_s0 = scalar_select %p71_p2, %s1120_s23, %s73_s11  }
  0x2b   : > { %s1550_s1 = sld [smem:[#allocation25_spill]]  ;;  %s237_s29 = scalar_lea.vmem [#allocation7], %s698_s30 }
  0x2c   : > { %1549 = sst [smem:[#allocation23_spill]] %s1289_s0  ;;  %s247_s21 = sshll.u32 %s237_s29, 4  ;;  %s248_s21 = int_to_ptr.vmem [resolvable:$true] %s247_s21 }
  0x2d   : > { %p744_p4 = pnand %p759_p11, %p1270_p12  ;;  %s234_s11 = scalar_lea.sflag [#allocation4], %s233_s16 }
  0x2e   : > { %s691_s9 = sadd.s32 4294967294, %s1140_s28   ;;  %s99_s26 = sadd.s32 1, %s1108_s20 }
  0x2f   : > { %p106_p5 = scmp.ne.s32.totalorder %s1108_s20, %s1104_s19  ;;  %p112_p6 = scmp.ne.s32.totalorder %s1104_s19, %s1100_s18 }
  0x30   : > { %s1305_s3 = scalar_select %p1283_p0, %s1108_s20, %s99_s26  }
  0x31   : > { %s243_s14 = scalar_lea.hbm %s1550_s1, %s700_s6  ;;  %p157_p7 = scmp.eq.s32.totalorder %s1235_s7, 3 }
  0x32   : > { %s245_s17 = sshll.u32 %s243_s14, 4  ;;  %p163_p8 = scmp.eq.s32.totalorder %s691_s9, 3  ;;  %s246_s17 = int_to_ptr.hbm [resolvable:$true] %s245_s17 }
  0x33   : > { %746 = dma.hbm_to_vmem [thread:$0]  (!%p744_p4), %s246_s17, 128, %s248_s21, %s234_s11  }
  0x34   : > { %p1312_p10 = por %p106_p5, %p81_p9  ;;  %p1318_p12 = por %p112_p6, %p87_p1 }
  0x35   : > { %p1322_p2 = por %p157_p7, %p106_p5  ;;  %p1326_p0 = por %p163_p8, %p112_p6 }
  0x36   : > { %s254_s15 = sand.u32 1, %s1140_s28   ;;  %s256_s16 = sand.u32 1, %s1108_s20  }
  0x37   : > { %s701_s30 = sshll.u32 %s256_s16, 3  ;;  %s702_s6 = sshll.u32 %s1136_s27, 3 }
  0x38   : > { %s262_s21 = scalar_lea.hbm %s1530_s2, %s702_s6  ;;  %s258_s9 = scalar_lea.vmem [#allocation8], %s701_s30 }
  0x39   : > { %s264_s11 = sshll.u32 %s262_s21, 4  ;;  %s266_s1 = sshll.u32 %s258_s9, 4  ;;  %s265_s11 = int_to_ptr.hbm [resolvable:$true] %s264_s11  ;;  %s267_s1 = int_to_ptr.vmem [resolvable:$true] %s266_s1 }
  0x3a   : > { %p747_p9 = pnand %p759_p11, %p1312_p10  ;;  %s255_s0 = scalar_lea.sflag [#allocation9], %s254_s15 }
  0x3b   : > { %275 = sbr.rel (%p1240_p3) target bundleno = 965 (0x3c5), region = 36 }
  0x3c   : > { %749 = dma.hbm_to_vmem [thread:$0]  (!%p747_p9), %s265_s11, 128, %s267_s1, %s255_s0  }
  0x40   : > { %1075 = dma.done.wait (%p87_p1), [#allocation6], 16  }
  0x41   : > { %1077 = vsyncadd (%p87_p1), [#allocation6], 4294967280  ;;  %s282_s16 = sand.u32 1, %s1116_s22  }
  0x42   : > { %s1347_s30 = sshll.u32 %s282_s16, 3  ;;  %s283_s29 = scalar_lea.sflag [#allocation4], %s282_s16 }
  0x43   : > { %s286_s6 = scalar_lea.vmem [#allocation7], %s1347_s30 }
  0x44   : > { %1079 = dma.done.wait (%p1276_p13), %s283_s29, 128  }
  0x45   : > { %1081 = vsyncadd (%p1276_p13), %s283_s29, 4294967168  ;;  %s292_s0 = sand.u32 1, %s1235_s7   ;;  %s1356_s1 = sand.u32 1, %s1104_s19  }
  0x46   : > { %s1359_s8 = sshll.u32 %s1356_s1, 3  ;;  %s293_s15 = scalar_lea.sflag [#allocation9], %s292_s0 }
  0x47   : > { %s296_s13 = scalar_lea.vmem [#allocation8], %s1359_s8 }
  0x48   : > { %1083 = dma.done.wait (%p1318_p12), %s293_s15, 128  }
  0x49   : > { %1085 = vsyncadd (%p1318_p12), %s293_s15, 4294967168 }
  0x4a   : > { %1087 = dma.done.wait (%p87_p1), [#allocation9], 2048  }
  0x4b   : > { %1089 = vsyncadd (%p87_p1), [#allocation9], 4294965248 }
  0x4c   : > { %307 = sfence }
  0x4d   : > { %v1370_v0 = vld [vmem:[#allocation10] sm:$0xff]  ;;  %v1372_v1 = vld [vmem:[#allocation10 + $0x8] sm:$0xff]  ;;  %v1374_v2 = vld [vmem:[#allocation10 + $0x10] sm:$0xff]  ;;  %s1376_s12 = sld [smem:[#allocation3]]  ;;  %s1407_s7 = scalar_lea.vmem [#allocation11], %s1359_s8 }
  0x4e   : > { %v1378_v3 = vld [vmem:[#allocation10 + $0x18] sm:$0xff]  ;;  %v1380_v4 = vld [vmem:[#allocation10 + $0x20] sm:$0xff]  ;;  %v1382_v5 = vld [vmem:[#allocation10 + $0x28] sm:$0xff]  ;;  %s1384_s10 = sld [smem:[#allocation3 + $0x1]]  ;;  %s1410_s14 = scalar_lea.vmem [#allocation12], %s1359_s8 }
  0x4f   : > { %v1386_v6 = vld [vmem:[#allocation10 + $0x30] sm:$0xff]  ;;  %v1388_v7 = vld [vmem:[#allocation10 + $0x38] sm:$0xff]  ;;  %v1390_v8 = vld [vmem:[#allocation10 + $0x40] sm:$0xff]  ;;  %p711_p1 = scmp.ne.s32.totalorder %s1124_s24, 0 }
  0x50   : > { %v1392_v9 = vld [vmem:[#allocation10 + $0x48] sm:$0xff]  ;;  %v1394_v10 = vld [vmem:[#allocation10 + $0x50] sm:$0xff]  ;;  %v1396_v11 = vld [vmem:[#allocation10 + $0x58] sm:$0xff] }
  0x51   : > { %v1398_v12 = vld [vmem:[#allocation10 + $0x60] sm:$0xff]  ;;  %v1400_v13 = vld [vmem:[#allocation10 + $0x68] sm:$0xff]  ;;  %v1402_v14 = vld [vmem:[#allocation10 + $0x70] sm:$0xff]  ;;  %363 = sbr.rel (%p711_p1) target bundleno = 508 (0x1fc), region = 56 }
  0x52   : > { %v1404_v15 = vld [vmem:[#allocation10 + $0x78] sm:$0xff] }
  0x56   : > { %365 = vmatpush.msra.mxu0 %v1404_v15  ;;  %v364_v16 = vld [vmem:[%s296_s13] sm:$0xff]  ;;  %v399_v27 = vstv %s1384_s10 }
  0x57   : > { %v385_v17 = vmul.f32 %v364_v16, %v364_v16 }
  0x58   : > { %366 = vmatpush.msra.mxu0 %v1402_v14 }
  0x59   : > { %386 = vadd.xlane.f32.xlu0 %v385_v17 }
  0x5a   : > { %367 = vmatpush.msra.mxu0 %v1400_v13 }
  0x5c   : > { %368 = vmatpush.msra.mxu0 %v1398_v12 }
  0x5e   : > { %369 = vmatpush.msra.mxu0 %v1396_v11 }
  0x60   : > { %370 = vmatpush.msra.mxu0 %v1394_v10 }
  0x62   : > { %371 = vmatpush.msra.mxu0 %v1392_v9 }
  0x64   : > { %372 = vmatpush.msra.mxu0 %v1390_v8 }
  0x66   : > { %373 = vmatpush.msra.mxu0 %v1388_v7 }
  0x68   : > { %374 = vmatpush.msra.mxu0 %v1386_v6 }
  0x6a   : > { %375 = vmatpush.msra.mxu0 %v1382_v5 }
  0x6c   : > { %376 = vmatpush.msra.mxu0 %v1380_v4 }
  0x6e   : > { %377 = vmatpush.msra.mxu0 %v1378_v3 }
  0x70   : > { %378 = vmatpush.msra.mxu0 %v1374_v2 }
  0x72   : > { %379 = vmatpush.msra.mxu0 %v1372_v1 }
  0x74   : > { %380 = vmatpush.msra.mxu0 %v1370_v0 }
  0x75   : > { %381 = vmatmul.f32.vlgmr.msra.gmra.mxu0 %v364_v16 }
  0xcc   : > { %v387_v18 = vpop.xlane.xlu0 %386 }
  0xcd   : > { %v388_v19 = vmax.f32 %v387_v18, 1e-24 }
  0xcf   : > { %855 = vrsqrt.f32 %v388_v19  ;;  %vm395_vm0 = vweird.f32 %v388_v19 }
  0xd5   : > { %v856_v20 = vpop.eup %855 }
  0xd6   : > { %v390_v21 = vmul.f32 %v856_v20, %v388_v19  ;;  %vm396_vm1 = vweird.f32 %v856_v20 }
  0xd7   : > { %vm397_vm2 = vmor %vm395_vm0, %vm396_vm1 }
  0xd8   : > { %v391_v22 = vmul.f32 %v856_v20, %v390_v21 }
  0xda   : > { %v392_v23 = vmul.f32 0.5, %v391_v22 }
  0xdc   : > { %v393_v24 = vsub.f32 1.5, %v392_v23 }
  0xde   : > { %v394_v25 = vmul.f32 %v856_v20, %v393_v24 }
  0xe0   : > { %v398_v26 = vsel %vm397_vm2, %v856_v20, %v394_v25 }
  0xe1   : > { %v400_v28 = vmul.f32 %v399_v27, %v398_v26 }
  0xf2   : > { %v382_v29 = vpop.f32.mrf.mxu0 }
  0xf3   : > { %v401_v30 = vmul.f32 %v400_v28, %v382_v29 }
  0xf5   : > { %402 = vmax.xlane.f32.xlu0 %v401_v30 }
 0x168   : > { %v403_v31 = vpop.xlane.xlu0 %402 }
 0x169   : > { %v404_v32 = vsub.f32 %v401_v30, %v403_v31 }
 0x16b   : > { %v405_v33 = vmul.f32 1.442695, %v404_v32 }
 0x16d   : > { %857 = vpow2.f32 %v405_v33 }
 0x173   : > { %v858_v34 = vpop.eup %857 }
 0x174   : > { %407 = vadd.xlane.f32.xlu1 %v858_v34 }
 0x1e7   : > { %v408_v35 = vpop.xlane.xlu1 %407 }
 0x1e8   : > { %859 = vrcp.f32 %v408_v35  ;;  %v420_v39 = vand.u32 2147483648, %v408_v35  ;;  %v418_v41 = vand.u32 2147483647, %v408_v35  ;;  %vm414_vm4 = vweird.f32 %v408_v35 }
 0x1ea   : > { %v421_v43 = vor.u32 1.1754944e-38, %v420_v39  ;;  %vm419_vm6 = vcmp.eq.f32.partialorder %v418_v41, 8.507059e+37 }
 0x1ee   : > { %v860_v36 = vpop.eup %859 }
 0x1ef   : > { %v410_v37 = vmul.f32 %v860_v36, %v408_v35  ;;  %vm415_vm3 = vweird.f32 %v860_v36 }
 0x1f0   : > { %vm416_vm5 = vmor %vm414_vm4, %vm415_vm3 }
 0x1f1   : > { %v411_v38 = vsub.f32 1.0, %v410_v37 }
 0x1f3   : > { %v412_v40 = vmul.f32 %v860_v36, %v411_v38 }
 0x1f5   : > { %v413_v42 = vadd.f32 %v860_v36, %v412_v40 }
 0x1f7   : > { %v417_v44 = vsel %vm416_vm5, %v860_v36, %v413_v42 }
 0x1f8   : > { %v422_v45 = vsel %vm419_vm6, %v421_v43, %v417_v44 }
 0x1f9   : > { %v424_v46 = vmul.f32 %v858_v34, %v422_v45 }
 0x1fb   : > { %425 = vst [vmem:[#allocation2] sm:$0xff] %v424_v46 }
 0x1fc PF: > { %427 = vmatpush.msra.mxu0 %v1404_v15  ;;  %v426_v47 = vld [vmem:[%s286_s6] sm:$0xff]  ;;  %v461_v58 = vstv %s1376_s12 }
 0x1fd   : > { %v447_v48 = vmul.f32 %v426_v47, %v426_v47 }
 0x1fe   : > { %428 = vmatpush.msra.mxu0 %v1402_v14 }
 0x1ff   : > { %448 = vadd.xlane.f32.xlu0 %v447_v48 }
 0x200   : > { %429 = vmatpush.msra.mxu0 %v1400_v13 }
 0x202   : > { %430 = vmatpush.msra.mxu0 %v1398_v12 }
 0x204   : > { %431 = vmatpush.msra.mxu0 %v1396_v11 }
 0x206   : > { %432 = vmatpush.msra.mxu0 %v1394_v10 }
 0x208   : > { %433 = vmatpush.msra.mxu0 %v1392_v9 }
 0x20a   : > { %434 = vmatpush.msra.mxu0 %v1390_v8 }
 0x20c   : > { %435 = vmatpush.msra.mxu0 %v1388_v7 }
 0x20e   : > { %436 = vmatpush.msra.mxu0 %v1386_v6  ;;  %v476_v6 = vld [vmem:[#allocation2] sm:$0xff] }
 0x210   : > { %437 = vmatpush.msra.mxu0 %v1382_v5 }
 0x212   : > { %438 = vmatpush.msra.mxu0 %v1380_v4 }
 0x214   : > { %439 = vmatpush.msra.mxu0 %v1378_v3 }
 0x216   : > { %440 = vmatpush.msra.mxu0 %v1374_v2 }
 0x218   : > { %441 = vmatpush.msra.mxu0 %v1372_v1 }
 0x21a   : > { %442 = vmatpush.msra.mxu0 %v1370_v0 }
 0x21b   : > { %443 = vmatmul.f32.vlgmr.msra.gmra.mxu0 %v426_v47 }
 0x272   : > { %v449_v49 = vpop.xlane.xlu0 %448 }
 0x273   : > { %v450_v50 = vmax.f32 %v449_v49, 1e-24 }
 0x275   : > { %861 = vrsqrt.f32 %v450_v50  ;;  %vm457_vm7 = vweird.f32 %v450_v50 }
 0x27b   : > { %v862_v51 = vpop.eup %861 }
 0x27c   : > { %v452_v52 = vmul.f32 %v862_v51, %v450_v50  ;;  %vm458_vm8 = vweird.f32 %v862_v51 }
 0x27d   : > { %vm459_vm9 = vmor %vm457_vm7, %vm458_vm8 }
 0x27e   : > { %v453_v53 = vmul.f32 %v862_v51, %v452_v52 }
 0x280   : > { %v454_v54 = vmul.f32 0.5, %v453_v53 }
 0x282   : > { %v455_v55 = vsub.f32 1.5, %v454_v54 }
 0x284   : > { %v456_v56 = vmul.f32 %v862_v51, %v455_v55 }
 0x286   : > { %v460_v57 = vsel %vm459_vm9, %v862_v51, %v456_v56 }
 0x287   : > { %v462_v59 = vmul.f32 %v461_v58, %v460_v57 }
 0x298   : > { %v444_v60 = vpop.f32.mrf.mxu0 }
 0x299   : > { %v463_v61 = vmul.f32 %v462_v59, %v444_v60 }
 0x29b   : > { %464 = vmax.xlane.f32.xlu0 %v463_v61 }
 0x30e   : > { %v465_v62 = vpop.xlane.xlu0 %464 }
 0x30f   : > { %v466_v63 = vsub.f32 %v463_v61, %v465_v62 }
 0x311   : > { %v467_v0 = vmul.f32 1.442695, %v466_v63 }
 0x313   : > { %863 = vpow2.f32 %v467_v0 }
 0x319   : > { %v864_v1 = vpop.eup %863 }
 0x31a   : > { %469 = vadd.xlane.f32.xlu1 %v864_v1 }
 0x38d   : > { %v470_v2 = vpop.xlane.xlu1 %469 }
 0x38e   : > { %865 = vlog2.f32 %v470_v2 }
 0x38f   : > { %867 = vrcp.f32 %v470_v2 }
 0x394   : > { %v866_v3 = vpop.eup %865 }
 0x395   : > { %v868_v4 = vpop.eup %867  ;;  %v472_v5 = vmul.f32 0.6931472, %v866_v3  ;;  %482 = sbr.rel (%p711_p1) target bundleno = 924 (0x39c), region = 60 }
 0x396   : > { %v475_v7 = vmul.f32 %v868_v4, %v864_v1 }
 0x397   : > { %v473_v8 = vsub.f32 %v466_v63, %v472_v5 }
 0x399   : > { %v477_v9 = vmul.f32 %v476_v6, %v473_v8 }
 0x39a   : > { %484 = vst [vmem:[%s1410_s14] sm:$0xff] %v475_v7 }
 0x39b   : > { %483 = vst [vmem:[%s1407_s7] sm:$0xff] %v477_v9 }
 0x39c PF: > { %p713_p3 = scmp.le.s32.totalorder %s1124_s24, 0 }
 0x39e   : > { %488 = sbr.rel (%p713_p3) target bundleno = 936 (0x3a8), region = 64 }
 0x3a3   : > { %v489_v10 = vld [vmem:[%s1407_s7] sm:$0xff]  ;;  %v492_v11 = vld [vmem:[%s1410_s14] sm:$0xff] }
 0x3a4   : > { %v490_v12 = vadd.f32 %v489_v10, %v477_v9  ;;  %v493_v13 = vadd.f32 %v492_v11, %v475_v7 }
 0x3a6   : > { %491 = vst [vmem:[%s1407_s7] sm:$0xff] %v490_v12 }
 0x3a7   : > { %494 = vst [vmem:[%s1410_s14] sm:$0xff] %v493_v13 }
 0x3a8 PF: > { %s716_s21 = sshll.u32 %s1128_s25, 3  ;;  %s513_s16 = sshll.u32 %s1407_s7, 4  ;;  %s514_s16 = int_to_ptr.vmem [resolvable:$true] %s513_s16 }
 0x3a9   : > { %s511_s24 = scalar_lea.hbm %s1532_s4, %s716_s21  ;;  %s496_s29 = scalar_lea.sflag [#allocation5], %s1356_s1 }
 0x3aa   : > { %s515_s30 = sshll.u32 %s511_s24, 4  ;;  %s994_s25 = scalar_lea.hbm %s1532_s4, 16  ;;  %s516_s30 = int_to_ptr.hbm [resolvable:$true] %s515_s30 }
 0x3ab   : > { %s988_s6 = sshra.s32 %s516_s30, 4  ;;  %s989_s6 = int_to_ptr.hbm [resolvable:$true] %s988_s6 }
 0x3ac   : > { %s990_s0 = scalar_lea.hbm %s989_s6, 8  ;;  %p995_p5 = scmp.lt.s32.totalorder %s989_s6, %s1532_s4 }
 0x3ad   : > { %p991_p11 = scmp.ne.s32.totalorder %s989_s6, %s990_s0  ;;  %p996_p6 = scmp.lt.s32.totalorder %s994_s25, %s990_s0 }
 0x3af   : > { %p992_p13 = pnand %p991_p11, %p1322_p2  ;;  %p997_p7 = por %p996_p6, %p995_p5 }
 0x3b1   : > { %p993_p4 = pneg %p992_p13 }
 0x3b3   : > { %p998_p8 = pnand %p997_p7, %p993_p4 }
 0x3b5   : > { %1001 = shalt.err (!%p998_p8)
}
 0x3b6   : > { %732 = dma.vmem_to_hbm [thread:$0]  (%p1322_p2), %s514_s16, 128, %s516_s30, %s496_s29  }
 0x3b7   : > { %s525_s11 = scalar_lea.hbm %s1533_s5, %s716_s21  ;;  %s527_s9 = sshll.u32 %s1410_s14, 4  ;;  %s528_s9 = int_to_ptr.vmem [resolvable:$true] %s527_s9 }
 0x3b8   : > { %s529_s24 = sshll.u32 %s525_s11, 4  ;;  %s501_s8 = scalar_lea.sflag [#allocation13], %s1356_s1  ;;  %s530_s24 = int_to_ptr.hbm [resolvable:$true] %s529_s24 }
 0x3b9   : > { %s1016_s6 = sshra.s32 %s530_s24, 4  ;;  %s1022_s16 = scalar_lea.hbm %s1533_s5, 16  ;;  %s1017_s6 = int_to_ptr.hbm [resolvable:$true] %s1016_s6 }
 0x3ba   : > { %s1018_s0 = scalar_lea.hbm %s1017_s6, 8  ;;  %p1023_p1 = scmp.lt.s32.totalorder %s1017_s6, %s1533_s5 }
 0x3bb   : > { %p1019_p10 = scmp.ne.s32.totalorder %s1017_s6, %s1018_s0  ;;  %p1024_p3 = scmp.lt.s32.totalorder %s1022_s16, %s1018_s0 }
 0x3bd   : > { %p1020_p12 = pnand %p1019_p10, %p1322_p2  ;;  %p1025_p11 = por %p1024_p3, %p1023_p1 }
 0x3bf   : > { %p1021_p9 = pneg %p1020_p12 }
 0x3c1   : > { %p1026_p13 = pnand %p1025_p11, %p1021_p9 }
 0x3c3   : > { %1029 = shalt.err (!%p1026_p13)
}
 0x3c4   : > { %733 = dma.vmem_to_hbm [thread:$0]  (%p1322_p2), %s528_s9, 128, %s530_s24, %s501_s8  }
 0x3c5 PF: > { %p762_p4 = scmp.ge.s32.totalorder %s1140_s28, 2  ;;  %s541_s1 = sand.u32 1, %s1100_s18  }
 0x3c6   : > { %s542_s14 = scalar_lea.sflag [#allocation5], %s541_s1 }
 0x3c7   : > { %p751_p5 = pnand %p762_p4, %p1326_p0 }
 0x3c9   : > { %p752_p6 = pneg %p751_p5 }
 0x3cb   : > { %1091 = dma.done.wait (%p752_p6), %s542_s14, 128  }
 0x3cc   : > { %1093 = vsyncadd (%p752_p6), %s542_s14, 4294967168  ;;  %s552_s21 = scalar_lea.sflag [#allocation13], %s541_s1 }
 0x3cd   : > { %1095 = dma.done.wait (%p752_p6), %s552_s21, 128  }
 0x3ce   : > { %1097 = vsyncadd (%p752_p6), %s552_s21, 4294967168  ;;  %s29_s28 = sadd.s32 1, %s1140_s28   ;;  %s1555_s17 = sld [smem:[#allocation23_spill]] }
 0x3cf   : > { %p26_p7 = scmp.ge.s32.totalorder %s29_s28, 6   ;;  %s1556_s24 = sld [smem:[#allocation20_spill]] }
 0x3d0   : > { %s1557_s26 = sld [smem:[#allocation21_spill]]  ;;  %s1559_s18 = smov %s1104_s19 }
 0x3d1   : > { %s1558_s13 = sld [smem:[#allocation22_spill]]  ;;  %s1560_s19 = smov %s1108_s20 }
 0x3d2   : > { %s1561_s20 = smov %s1305_s3  ;;  %s1562_s21 = smov %s1116_s22 }
 0x3d3   : > { %s1563_s22 = smov %s1120_s23  ;;  %s1565_s25 = smov %s1136_s27 }
 0x3d4   : > { %s1564_s23 = smov %s1555_s17  ;;  %28 = sbr.rel (!%p26_p7) target bundleno = 18 (0x12), region = 132 }
 0x3d7   : > { %s1566_s27 = smov %s1558_s13 }
 0x3d9   :  { %558 = vsyncpa [#allocation4], 1 }
 0x3da   :  { %560 = vsyncpa [#allocation4 + $0x1], 1 }
 0x3db   :  { %561 = vsyncpa [#allocation9], 1 }
 0x3dc   :  { %563 = vsyncpa [#allocation9 + $0x1], 1 }
 0x3dd   :  { %564 = vsyncpa [#allocation5], 1 }
 0x3de   :  { %566 = vsyncpa [#allocation5 + $0x1], 1 }
 0x3df   :  { %567 = vsyncpa [#allocation13], 1 }
 0x3e0   :  { %569 = vsyncpa [#allocation13 + $0x1], 1 }
 0x3e1   :  { %570 = vsyncpa [#allocation6], 1 }
 0x3e2   :  { %572 = vsyncpa [#allocation6 + $0x1], 1 }

</bundles_post_ra>
